<compile_context>
chip_gen: v7x
topology: tpu7x:2x2x1
jax: 0.10.0
libtpu: 0.0.40
codegen_flags: <defaults>
</compile_context>

<pallas_src>
import functools

import jax
import jax.numpy as jnp
from jax.experimental import pallas as pl
from jax.experimental.pallas import tpu as pltpu


def _band_matrix(n, dtype=jnp.float32):
    """Tri-diagonal matrix of ones: band[i, k] = 1 if |i - k| <= 1 else 0."""
    idx = jnp.arange(n)
    return (jnp.abs(idx[:, None] - idx[None, :]) <= 1).astype(dtype)


def edge_loss_kernel(logits_ref, label_ref, ah_ref, bw_ref, out_ref,
                     *, n_classes, alpha, smooth):
    C = n_classes
    x = logits_ref[0].astype(jnp.float32)     # [C, H, W]
    lab = label_ref[0].astype(jnp.float32)    # [H, W]
    A_h = ah_ref[...]                         # [H, H]  (resident, built once in wrapper)
    B_w = bw_ref[...]                         # [W, W]
    H = A_h.shape[0]
    W = B_w.shape[0]

    # ---- softmax over the channel axis (stacked: one exp, one normalize) ----
    m = x[0]
    for c in range(1, C):
        m = jnp.maximum(m, x[c])
    e = jnp.exp(x - m[None, :, :])            # single stacked EUP push, [C, H, W]
    s = e[0]
    for c in range(1, C):
        s = s + e[c]
    inv_s = pl.reciprocal(s, approx=True)     # EUP, ~free alongside VPU work
    preds = e * inv_s[None, :, :]             # [C, H, W] softmax probabilities

    # ---- depthwise Laplacian: conv(p) = A_h @ p @ B_w - 9 p  (zero-padded box sum) ----
    # Column-neighbor (right) multiply batched over all channels: one big MXU matmul.
    yr = jnp.dot(preds.reshape(C * H, W), B_w,
                 preferred_element_type=jnp.float32).reshape(C, H, W)

    # Row-neighbor (left) multiply per channel + channel-wise squared accumulation.
    norm = jnp.zeros((H, W), jnp.float32)
    for c in range(C):
        nb = jnp.dot(A_h, yr[c], preferred_element_type=jnp.float32)
        ce = nb - 9.0 * preds[c]              # conv2d(pred, laplacian, padding=1), channel c
        norm = norm + ce * ce
    prededge = norm * pl.reciprocal(norm + alpha, approx=True)   # norm / (norm + alpha)

    # ---- label edge map (exact f32 path): Laplacian conv, nonzero -> 1 ----
    nl = jnp.dot(jnp.dot(A_h, lab, preferred_element_type=jnp.float32), B_w,
                 preferred_element_type=jnp.float32)
    lbedge = ((nl - 9.0 * lab) != 0.0).astype(jnp.float32)       # [H, W]

    # ---- binary dice term for this batch element (smooth=1, p=2) ----
    inter = jnp.sum(prededge * lbedge)
    den = jnp.sum(prededge * prededge + lbedge * lbedge)
    loss_n = 1.0 - (2.0 * inter + smooth) / (den + smooth)

    out_ref[...] = jnp.zeros_like(out_ref) + loss_n              # this batch element's term


def edge_loss(logits, label, *, radius=1, alpha=0.01, smooth=1.0):
    """Pallas implementation of EdgeLoss.forward. Returns a scalar float32 loss."""
    assert radius == 1, "kernel implements the default radius=1 (3x3) case"
    N, C, H, W = logits.shape
    assert label.shape == (N, H, W)

    band_h = _band_matrix(H)   # [H, H], built once on host/XLA side
    band_w = _band_matrix(W)   # [W, W]

    kernel = functools.partial(
        edge_loss_kernel, n_classes=C, alpha=float(alpha), smooth=float(smooth)
    )
    per_batch = pl.pallas_call(
        kernel,
        out_shape=jax.ShapeDtypeStruct((N, 1, 1), jnp.float32),
        grid_spec=pltpu.PrefetchScalarGridSpec(
            num_scalar_prefetch=0,
            grid=(N,),
            in_specs=[
                pl.BlockSpec((1, C, H, W), lambda n: (n, 0, 0, 0)),  # native dtype, cast in-kernel
                pl.BlockSpec((1, H, W), lambda n: (n, 0, 0)),
                pl.BlockSpec((H, H), lambda n: (0, 0)),              # resident across the grid
                pl.BlockSpec((W, W), lambda n: (0, 0)),              # resident across the grid
            ],
            out_specs=pl.BlockSpec((1, 1, 1), lambda n: (n, 0, 0)),
        ),
        compiler_params=pltpu.CompilerParams(
            dimension_semantics=("parallel",),   # batch elements are independent (2 TCs on v7x)
        ),
    )(logits, label, band_h, band_w)

    # PyTorch BinaryDiceLoss in this module returns loss.sum() over the batch.
    return jnp.sum(per_batch)


if __name__ == "__main__":
    key = jax.random.PRNGKey(0)
    k1, k2 = jax.random.split(key)

    N, C, H, W = 2, 4, 16, 16  # small shapes consistent with [N, n_classes, H, W] logits
    logits = jax.random.normal(k1, (N, C, H, W), dtype=jnp.float32)
    label = jax.random.randint(k2, (N, H, W), 0, C).astype(jnp.float32)

    loss = edge_loss(logits, label, radius=1, alpha=0.01, smooth=1.0)
    jax.block_until_ready(loss)
    print("KERNEL_OK")
</pallas_src>

<mosaic_0001>
module attributes {stable_mosaic.version = 11 : i64} {
  func.func @edge_loss_kernel(%arg0: i32, %arg1: memref<1x4x16x16xf32, #tpu.memory_space<vmem>>, %arg2: memref<1x16x16xf32, #tpu.memory_space<vmem>>, %arg3: memref<16x16xf32, #tpu.memory_space<vmem>>, %arg4: memref<16x16xf32, #tpu.memory_space<vmem>>, %arg5: memref<1x1x1xf32, #tpu.memory_space<vmem>>) attributes {dimension_semantics = [#tpu.dimension_semantics<parallel>], iteration_bounds = array<i64: 2>, scalar_prefetch = 0 : i64, scratch_operands = 0 : i64, tpu.core_type = #tpu.core_type<tc>, window_params = [{transform_indices = @transform_0, window_bounds = array<i64: 1, 4, 16, 16>}, {transform_indices = @transform_1, window_bounds = array<i64: 1, 16, 16>}, {pipeline_mode = #tpu.pipeline_mode<synchronous>, transform_indices = @transform_2, window_bounds = array<i64: 16, 16>}, {pipeline_mode = #tpu.pipeline_mode<synchronous>, transform_indices = @transform_3, window_bounds = array<i64: 16, 16>}, {transform_indices = @transform_4, window_bounds = array<i64: 1, 1, 1>}]} {
    %c0 = arith.constant 0 : index
    %c0_0 = arith.constant 0 : index
    %c0_1 = arith.constant 0 : index
    %c0_2 = arith.constant 0 : index
    %0 = vector.load %arg1[%c0, %c0_0, %c0_1, %c0_2] : memref<1x4x16x16xf32, #tpu.memory_space<vmem>>, vector<1x4x16x16xf32>
    %1 = vector.shape_cast %0 : vector<1x4x16x16xf32> to vector<4x16x16xf32>
    %c0_3 = arith.constant 0 : index
    %c0_4 = arith.constant 0 : index
    %c0_5 = arith.constant 0 : index
    %2 = vector.load %arg2[%c0_3, %c0_4, %c0_5] : memref<1x16x16xf32, #tpu.memory_space<vmem>>, vector<1x16x16xf32>
    %3 = vector.shape_cast %2 : vector<1x16x16xf32> to vector<16x16xf32>
    %c0_6 = arith.constant 0 : index
    %c0_7 = arith.constant 0 : index
    %4 = vector.load %arg3[%c0_6, %c0_7] : memref<16x16xf32, #tpu.memory_space<vmem>>, vector<16x16xf32>
    %c0_8 = arith.constant 0 : index
    %c0_9 = arith.constant 0 : index
    %5 = vector.load %arg4[%c0_8, %c0_9] : memref<16x16xf32, #tpu.memory_space<vmem>>, vector<16x16xf32>
    %6 = vector.extract_strided_slice %1 {offsets = [0, 0, 0], sizes = [1, 16, 16], strides = [1, 1, 1]} : vector<4x16x16xf32> to vector<1x16x16xf32>
    %7 = vector.shape_cast %6 : vector<1x16x16xf32> to vector<16x16xf32>
    %8 = vector.extract_strided_slice %1 {offsets = [1, 0, 0], sizes = [1, 16, 16], strides = [1, 1, 1]} : vector<4x16x16xf32> to vector<1x16x16xf32>
    %9 = vector.shape_cast %8 : vector<1x16x16xf32> to vector<16x16xf32>
    %10 = arith.maximumf %7, %9 : vector<16x16xf32>
    %11 = vector.extract_strided_slice %1 {offsets = [2, 0, 0], sizes = [1, 16, 16], strides = [1, 1, 1]} : vector<4x16x16xf32> to vector<1x16x16xf32>
    %12 = vector.shape_cast %11 : vector<1x16x16xf32> to vector<16x16xf32>
    %13 = arith.maximumf %10, %12 : vector<16x16xf32>
    %14 = vector.extract_strided_slice %1 {offsets = [3, 0, 0], sizes = [1, 16, 16], strides = [1, 1, 1]} : vector<4x16x16xf32> to vector<1x16x16xf32>
    %15 = vector.shape_cast %14 : vector<1x16x16xf32> to vector<16x16xf32>
    %16 = arith.maximumf %13, %15 : vector<16x16xf32>
    %17 = vector.shape_cast %16 : vector<16x16xf32> to vector<1x16x16xf32>
    %18 = vector.broadcast %17 : vector<1x16x16xf32> to vector<4x16x16xf32>
    %19 = arith.subf %1, %18 : vector<4x16x16xf32>
    %20 = math.exp %19 : vector<4x16x16xf32>
    %21 = vector.extract_strided_slice %20 {offsets = [0, 0, 0], sizes = [1, 16, 16], strides = [1, 1, 1]} : vector<4x16x16xf32> to vector<1x16x16xf32>
    %22 = vector.shape_cast %21 : vector<1x16x16xf32> to vector<16x16xf32>
    %23 = vector.extract_strided_slice %20 {offsets = [1, 0, 0], sizes = [1, 16, 16], strides = [1, 1, 1]} : vector<4x16x16xf32> to vector<1x16x16xf32>
    %24 = vector.shape_cast %23 : vector<1x16x16xf32> to vector<16x16xf32>
    %25 = arith.addf %22, %24 : vector<16x16xf32>
    %26 = vector.extract_strided_slice %20 {offsets = [2, 0, 0], sizes = [1, 16, 16], strides = [1, 1, 1]} : vector<4x16x16xf32> to vector<1x16x16xf32>
    %27 = vector.shape_cast %26 : vector<1x16x16xf32> to vector<16x16xf32>
    %28 = arith.addf %25, %27 : vector<16x16xf32>
    %29 = vector.extract_strided_slice %20 {offsets = [3, 0, 0], sizes = [1, 16, 16], strides = [1, 1, 1]} : vector<4x16x16xf32> to vector<1x16x16xf32>
    %30 = vector.shape_cast %29 : vector<1x16x16xf32> to vector<16x16xf32>
    %31 = arith.addf %28, %30 : vector<16x16xf32>
    %32 = tpu.reciprocal %31 {approx = true} : vector<16x16xf32> -> vector<16x16xf32>
    %33 = vector.shape_cast %32 : vector<16x16xf32> to vector<1x16x16xf32>
    %34 = vector.broadcast %33 : vector<1x16x16xf32> to vector<4x16x16xf32>
    %35 = arith.mulf %20, %34 : vector<4x16x16xf32>
    %36 = vector.shape_cast %35 : vector<4x16x16xf32> to vector<64x16xf32>
    %cst = arith.constant dense<0.000000e+00> : vector<64x16xf32>
    %37 = tpu.matmul %36, %5, %cst {dimension_numbers = #tpu.dot_dimension_numbers<[1], [0], [0], [1], [0, 0, 1, 1], [], []>} : vector<64x16xf32>, vector<16x16xf32>, vector<64x16xf32> -> vector<64x16xf32>
    %38 = vector.shape_cast %37 : vector<64x16xf32> to vector<4x16x16xf32>
    %cst_10 = arith.constant 0.000000e+00 : f32
    %39 = vector.broadcast %cst_10 : f32 to vector<16x16xf32>
    %40 = vector.extract_strided_slice %38 {offsets = [0, 0, 0], sizes = [1, 16, 16], strides = [1, 1, 1]} : vector<4x16x16xf32> to vector<1x16x16xf32>
    %41 = vector.shape_cast %40 : vector<1x16x16xf32> to vector<16x16xf32>
    %cst_11 = arith.constant dense<0.000000e+00> : vector<16x16xf32>
    %42 = tpu.matmul %4, %41, %cst_11 {dimension_numbers = #tpu.dot_dimension_numbers<[1], [0], [0], [1], [0, 0, 1, 1], [], []>} : vector<16x16xf32>, vector<16x16xf32>, vector<16x16xf32> -> vector<16x16xf32>
    %43 = vector.extract_strided_slice %35 {offsets = [0, 0, 0], sizes = [1, 16, 16], strides = [1, 1, 1]} : vector<4x16x16xf32> to vector<1x16x16xf32>
    %44 = vector.shape_cast %43 : vector<1x16x16xf32> to vector<16x16xf32>
    %cst_12 = arith.constant 9.000000e+00 : f32
    %45 = vector.broadcast %cst_12 : f32 to vector<16x16xf32>
    %46 = arith.mulf %45, %44 : vector<16x16xf32>
    %47 = arith.subf %42, %46 : vector<16x16xf32>
    %48 = arith.mulf %47, %47 : vector<16x16xf32>
    %49 = arith.addf %39, %48 : vector<16x16xf32>
    %50 = vector.extract_strided_slice %38 {offsets = [1, 0, 0], sizes = [1, 16, 16], strides = [1, 1, 1]} : vector<4x16x16xf32> to vector<1x16x16xf32>
    %51 = vector.shape_cast %50 : vector<1x16x16xf32> to vector<16x16xf32>
    %cst_13 = arith.constant dense<0.000000e+00> : vector<16x16xf32>
    %52 = tpu.matmul %4, %51, %cst_13 {dimension_numbers = #tpu.dot_dimension_numbers<[1], [0], [0], [1], [0, 0, 1, 1], [], []>} : vector<16x16xf32>, vector<16x16xf32>, vector<16x16xf32> -> vector<16x16xf32>
    %53 = vector.extract_strided_slice %35 {offsets = [1, 0, 0], sizes = [1, 16, 16], strides = [1, 1, 1]} : vector<4x16x16xf32> to vector<1x16x16xf32>
    %54 = vector.shape_cast %53 : vector<1x16x16xf32> to vector<16x16xf32>
    %cst_14 = arith.constant 9.000000e+00 : f32
    %55 = vector.broadcast %cst_14 : f32 to vector<16x16xf32>
    %56 = arith.mulf %55, %54 : vector<16x16xf32>
    %57 = arith.subf %52, %56 : vector<16x16xf32>
    %58 = arith.mulf %57, %57 : vector<16x16xf32>
    %59 = arith.addf %49, %58 : vector<16x16xf32>
    %60 = vector.extract_strided_slice %38 {offsets = [2, 0, 0], sizes = [1, 16, 16], strides = [1, 1, 1]} : vector<4x16x16xf32> to vector<1x16x16xf32>
    %61 = vector.shape_cast %60 : vector<1x16x16xf32> to vector<16x16xf32>
    %cst_15 = arith.constant dense<0.000000e+00> : vector<16x16xf32>
    %62 = tpu.matmul %4, %61, %cst_15 {dimension_numbers = #tpu.dot_dimension_numbers<[1], [0], [0], [1], [0, 0, 1, 1], [], []>} : vector<16x16xf32>, vector<16x16xf32>, vector<16x16xf32> -> vector<16x16xf32>
    %63 = vector.extract_strided_slice %35 {offsets = [2, 0, 0], sizes = [1, 16, 16], strides = [1, 1, 1]} : vector<4x16x16xf32> to vector<1x16x16xf32>
    %64 = vector.shape_cast %63 : vector<1x16x16xf32> to vector<16x16xf32>
    %cst_16 = arith.constant 9.000000e+00 : f32
    %65 = vector.broadcast %cst_16 : f32 to vector<16x16xf32>
    %66 = arith.mulf %65, %64 : vector<16x16xf32>
    %67 = arith.subf %62, %66 : vector<16x16xf32>
    %68 = arith.mulf %67, %67 : vector<16x16xf32>
    %69 = arith.addf %59, %68 : vector<16x16xf32>
    %70 = vector.extract_strided_slice %38 {offsets = [3, 0, 0], sizes = [1, 16, 16], strides = [1, 1, 1]} : vector<4x16x16xf32> to vector<1x16x16xf32>
    %71 = vector.shape_cast %70 : vector<1x16x16xf32> to vector<16x16xf32>
    %cst_17 = arith.constant dense<0.000000e+00> : vector<16x16xf32>
    %72 = tpu.matmul %4, %71, %cst_17 {dimension_numbers = #tpu.dot_dimension_numbers<[1], [0], [0], [1], [0, 0, 1, 1], [], []>} : vector<16x16xf32>, vector<16x16xf32>, vector<16x16xf32> -> vector<16x16xf32>
    %73 = vector.extract_strided_slice %35 {offsets = [3, 0, 0], sizes = [1, 16, 16], strides = [1, 1, 1]} : vector<4x16x16xf32> to vector<1x16x16xf32>
    %74 = vector.shape_cast %73 : vector<1x16x16xf32> to vector<16x16xf32>
    %cst_18 = arith.constant 9.000000e+00 : f32
    %75 = vector.broadcast %cst_18 : f32 to vector<16x16xf32>
    %76 = arith.mulf %75, %74 : vector<16x16xf32>
    %77 = arith.subf %72, %76 : vector<16x16xf32>
    %78 = arith.mulf %77, %77 : vector<16x16xf32>
    %79 = arith.addf %69, %78 : vector<16x16xf32>
    %cst_19 = arith.constant 0.00999999977 : f32
    %80 = vector.broadcast %cst_19 : f32 to vector<16x16xf32>
    %81 = arith.addf %79, %80 : vector<16x16xf32>
    %82 = tpu.reciprocal %81 {approx = true} : vector<16x16xf32> -> vector<16x16xf32>
    %83 = arith.mulf %79, %82 : vector<16x16xf32>
    %cst_20 = arith.constant dense<0.000000e+00> : vector<16x16xf32>
    %84 = tpu.matmul %4, %3, %cst_20 {dimension_numbers = #tpu.dot_dimension_numbers<[1], [0], [0], [1], [0, 0, 1, 1], [], []>} : vector<16x16xf32>, vector<16x16xf32>, vector<16x16xf32> -> vector<16x16xf32>
    %cst_21 = arith.constant dense<0.000000e+00> : vector<16x16xf32>
    %85 = tpu.matmul %84, %5, %cst_21 {dimension_numbers = #tpu.dot_dimension_numbers<[1], [0], [0], [1], [0, 0, 1, 1], [], []>} : vector<16x16xf32>, vector<16x16xf32>, vector<16x16xf32> -> vector<16x16xf32>
    %cst_22 = arith.constant 9.000000e+00 : f32
    %86 = vector.broadcast %cst_22 : f32 to vector<16x16xf32>
    %87 = arith.mulf %86, %3 : vector<16x16xf32>
    %88 = arith.subf %85, %87 : vector<16x16xf32>
    %cst_23 = arith.constant 0.000000e+00 : f32
    %89 = vector.broadcast %cst_23 : f32 to vector<16x16xf32>
    %90 = arith.cmpf one, %88, %89 : vector<16x16xf32>
    %91 = arith.extui %90 : vector<16x16xi1> to vector<16x16xi32>
    %92 = arith.sitofp %91 : vector<16x16xi32> to vector<16x16xf32>
    %93 = arith.mulf %83, %92 : vector<16x16xf32>
    %94 = vector.shape_cast %93 : vector<16x16xf32> to vector<1x16x16xf32>
    %cst_24 = arith.constant dense<0.000000e+00> : vector<1xf32>
    %95 = vector.multi_reduction <add>, %94, %cst_24 [1, 2] : vector<1x16x16xf32> to vector<1xf32>
    %96 = vector.shape_cast %95 : vector<1xf32> to vector<1x1x1xf32>
    %97 = vector.extract %96[0, 0, 0] : f32 from vector<1x1x1xf32>
    %98 = arith.mulf %83, %83 : vector<16x16xf32>
    %99 = arith.mulf %92, %92 : vector<16x16xf32>
    %100 = arith.addf %98, %99 : vector<16x16xf32>
    %101 = vector.shape_cast %100 : vector<16x16xf32> to vector<1x16x16xf32>
    %cst_25 = arith.constant dense<0.000000e+00> : vector<1xf32>
    %102 = vector.multi_reduction <add>, %101, %cst_25 [1, 2] : vector<1x16x16xf32> to vector<1xf32>
    %103 = vector.shape_cast %102 : vector<1xf32> to vector<1x1x1xf32>
    %104 = vector.extract %103[0, 0, 0] : f32 from vector<1x1x1xf32>
    %cst_26 = arith.constant 2.000000e+00 : f32
    %105 = arith.mulf %cst_26, %97 : f32
    %cst_27 = arith.constant 1.000000e+00 : f32
    %106 = arith.addf %105, %cst_27 : f32
    %cst_28 = arith.constant 1.000000e+00 : f32
    %107 = arith.addf %104, %cst_28 : f32
    %108 = arith.divf %106, %107 : f32
    %cst_29 = arith.constant 1.000000e+00 : f32
    %109 = arith.subf %cst_29, %108 : f32
    %cst_30 = arith.constant 0.000000e+00 : f32
    %110 = vector.broadcast %cst_30 : f32 to vector<1x1x1xf32>
    %111 = vector.broadcast %109 : f32 to vector<1x1x1xf32>
    %112 = arith.addf %110, %111 : vector<1x1x1xf32>
    %c0_31 = arith.constant 0 : index
    %c0_32 = arith.constant 0 : index
    %c0_33 = arith.constant 0 : index
    %113 = vector.load %arg5[%c0_31, %c0_32, %c0_33] : memref<1x1x1xf32, #tpu.memory_space<vmem>>, vector<1x1x1xf32>
    tpu.vector_store %arg5[%c0_31, %c0_32, %c0_33], %112 {strides = array<i32>} : memref<1x1x1xf32, #tpu.memory_space<vmem>>, vector<1x1x1xf32>,
    return
  }
  func.func @transform_0(%arg0: i32) -> (i32, i32, i32, i32) {
    %c0_i32 = arith.constant 0 : i32
    %c0_i32_0 = arith.constant 0 : i32
    %c0_i32_1 = arith.constant 0 : i32
    %c0_i32_2 = arith.constant 0 : i32
    return %arg0, %c0_i32, %c0_i32_0, %c0_i32_1 : i32, i32, i32, i32
  }
  func.func @transform_1(%arg0: i32) -> (i32, i32, i32) {
    %c0_i32 = arith.constant 0 : i32
    %c0_i32_0 = arith.constant 0 : i32
    %c0_i32_1 = arith.constant 0 : i32
    return %arg0, %c0_i32, %c0_i32_0 : i32, i32, i32
  }
  func.func @transform_2(%arg0: i32) -> (i32, i32) {
    %c0_i32 = arith.constant 0 : i32
    %c0_i32_0 = arith.constant 0 : i32
    %c0_i32_1 = arith.constant 0 : i32
    return %c0_i32, %c0_i32_0 : i32, i32
  }
  func.func @transform_3(%arg0: i32) -> (i32, i32) {
    %c0_i32 = arith.constant 0 : i32
    %c0_i32_0 = arith.constant 0 : i32
    %c0_i32_1 = arith.constant 0 : i32
    return %c0_i32, %c0_i32_0 : i32, i32
  }
  func.func @transform_4(%arg0: i32) -> (i32, i32, i32) {
    %c0_i32 = arith.constant 0 : i32
    %c0_i32_0 = arith.constant 0 : i32
    %c0_i32_1 = arith.constant 0 : i32
    return %arg0, %c0_i32, %c0_i32_0 : i32, i32, i32
  }
}

</mosaic_0001>

<bundles_post_ra>
// kernel: tpu_custom_call.1
= control target key start
LH: loop header
LB: loop body
LE: loop exit
PB: predicated region body
PF: predicated region fallthrough
CT: control target
= control target key end

     0   :  { %9 = vsyncpa [#allocation3], 0  ;;  %s1882_s0 = inlined_call_operand.hbm [shape: f32[2,4,16,16], index: 0, kind: input, shape index: {}]   ;;  %s1883_s1 = inlined_call_operand.hbm [shape: f32[2,16,16], index: 1, kind: input, shape index: {}]   ;;  %s1884_s2 = inlined_call_operand.hbm [shape: f32[16,16], index: 2, kind: input, shape index: {}]   ;;  %s1885_s3 = inlined_call_operand.hbm [shape: f32[16,16], index: 3, kind: input, shape index: {}]   ;;  %s1886_s4 = inlined_call_operand.vmem [shape: f32[2,1,1], index: 4, kind: output, shape index: {}]  }
   0x1   :  { %11 = vsyncpa [#allocation3 + $0x1], 0 }
   0x2   :  { %12 = vsyncpa [#allocation5], 0 }
   0x3   :  { %14 = vsyncpa [#allocation5 + $0x1], 0 }
   0x4   :  { %15 = vsyncpa [#allocation8], 0  ;;  %s1586_s15 = smov 0   ;;  %s1588_s16 = smov 0  }
   0x5   :  { %s1590_s17 = smov 0   ;;  %s1592_s18 = smov 0  }
   0x6 LB: > { %s1605_s19 = sadd.s32 4294967295, %s1552_s18   ;;  %p41_p0 = scmp.ne.s32.totalorder %s1544_s16, %s1540_s15  ;;  %s1552_s18 = sphi %s1592_s18, %s1903_s18   ;;  %s1548_s17 = sphi %s1590_s17, %s1902_s17   ;;  %s1544_s16 = sphi %s1588_s16, %s1901_s16   ;;  %s1540_s15 = sphi %s1586_s15, %s1900_s15  }
   0x7   : > { %p1887_p1 = scmp.eq.s32.totalorder %s1605_s19, 0  ;;  %p1129_p2 = scmp.ge.s32.totalorder %s1552_s18, 1 }
   0x8   : > { %p146_p3 = scmp.lt.s32.totalorder %s1552_s18, 3  ;;  %s1554_s22 = smov [#allocation6]  }
   0x9   : > { %p1613_p4 = por %p1887_p1, %p41_p0  ;;  %s158_s23 = sshll.u32 %s1554_s22, 4  ;;  %s159_s23 = int_to_ptr.vmem [resolvable:$true] %s158_s23 }
   0xa   : > { %p1617_p5 = pnand %p1129_p2, %p146_p3  ;;  %s1555_s25 = smov [#allocation7]  }
   0xb   : > { %s1890_s20 = scalar_select %p1613_p4, 1, 0 }
   0xc   : > { %s1891_s21 = scalar_select %p1617_p5, 1, 0 }
   0xd   : > { %p1308_p6 = pneg %p1617_p5  ;;  %s171_s26 = sshll.u32 %s1555_s25, 4  ;;  %s1629_s26 = int_to_ptr.vmem [resolvable:$true] %s171_s26 }
   0xe   : > { %s1390_s29 = scalar_lea.hbm %s1884_s2, 256 }
   0xf   : > { %p1625_p7 = pnand %p1308_p6, %p1887_p1  ;;  %p1391_p8 = scmp.ne.s32.totalorder %s1884_s2, %s1390_s29 }
  0x10   : > { %p1397_p12 = scmp.lt.u32.totalorder %s1390_s29, %s1884_s2 }
  0x11   : > { %p1392_p9 = pneg %p1625_p7 }
  0x13   : > { %p1393_p10 = pnand %p1392_p9, %p1391_p8 }
  0x15   : > { %p1394_p11 = pneg %p1393_p10 }
  0x17   : > { %p1399_p13 = pnand %p1397_p12, %p1394_p11 }
  0x19   : > { %1402 = shalt.err (!%p1399_p13)
}
  0x1a   : > { %s1403_s8 = scalar_lea.vmem %s159_s23, 256  ;;  %p1411_p6 = scmp.lt.s32.totalorder %s159_s23, %s159_s23 }
  0x1b   : > { %p1404_p0 = scmp.ne.s32.totalorder %s159_s23, %s1403_s8  ;;  %p1412_p1 = scmp.lt.s32.totalorder %s1403_s8, %s1403_s8 }
  0x1d   : > { %p1406_p2 = pnand %p1404_p0, %p1392_p9  ;;  %p1413_p4 = por %p1412_p1, %p1411_p6 }
  0x1f   : > { %p1407_p3 = pneg %p1406_p2 }
  0x21   : > { %p1414_p5 = pnand %p1413_p4, %p1407_p3 }
  0x23   : > { %1417 = shalt.err (!%p1414_p5)
}
  0x24   : > { %s1556_s9 = smov 128   ;;  %s1557_s10 = smov 8  }
  0x25   : > { %1311 = dma.hbm_to_vmem [thread:$0]  (!%p1625_p7), %s1884_s2, 256, %s159_s23, [#allocation5], %s1556_s9, %s1556_s9, %s1557_s10  }
  0x26   : > { %s1418_s15 = scalar_lea.hbm %s1885_s3, 256 }
  0x27   : > { %p1419_p1 = scmp.ne.s32.totalorder %s1885_s3, %s1418_s15  ;;  %p1425_p8 = scmp.lt.u32.totalorder %s1418_s15, %s1885_s3 }
  0x29   : > { %p1421_p4 = pnand %p1419_p1, %p1392_p9 }
  0x2b   : > { %p1422_p5 = pneg %p1421_p4 }
  0x2d   : > { %p1427_p10 = pnand %p1425_p8, %p1422_p5 }
  0x2f   : > { %1430 = shalt.err (!%p1427_p10)
}
  0x30   : > { %s1431_s23 = scalar_lea.vmem %s1629_s26, 256  ;;  %p1439_p0 = scmp.lt.s32.totalorder %s1629_s26, %s1629_s26 }
  0x31   : > { %p1432_p11 = scmp.ne.s32.totalorder %s1629_s26, %s1431_s23  ;;  %p1440_p2 = scmp.lt.s32.totalorder %s1431_s23, %s1431_s23 }
  0x33   : > { %p1434_p12 = pnand %p1432_p11, %p1392_p9  ;;  %p1441_p3 = por %p1440_p2, %p1439_p0 }
  0x35   : > { %p1435_p13 = pneg %p1434_p12 }
  0x37   : > { %p1442_p6 = pnand %p1441_p3, %p1435_p13 }
  0x39   : > { %1445 = shalt.err (!%p1442_p6)
}
  0x3a   : > { %1314 = dma.hbm_to_vmem [thread:$0]  (!%p1625_p7), %s1885_s3, 256, %s1629_s26, [#allocation8], %s1556_s9, %s1556_s9, %s1557_s10  }
  0x3b   : > { %s1685_s5 = sadd.s32 1, %s1552_s18   ;;  %s28_s24 = sadd.s32 1, %s1548_s17 }
  0x3c   : > { %s25_s6 = ssub.s32 %s1552_s18, %s1685_s5  ;;  %p35_p9 = scmp.ne.s32.totalorder %s1548_s17, %s1544_s16 }
  0x3d   : > { %p26_p1 = scmp.eq.s32.totalorder %s25_s6, 0  ;;  %p36_p4 = scmp.eq.s32.totalorder %s1552_s18, 0 }
  0x3e   : > { %p1324_p5 = scmp.lt.s32.totalorder %s1552_s18, 2  ;;  %s1695_s7 = sand.u32 1, %s1548_s17  }
  0x3f   : > { %s1698_s8 = scalar_select %p26_p1, %s1548_s17, %s28_s24  }
  0x40   : > { %p37_p8 = por %p36_p4, %p35_p9  ;;  %s1133_s11 = sshll.u32 %s1695_s7, 6 }
  0x41   : > { %s1168_s12 = sshll.u32 %s1552_s18, 10  ;;  %s189_s15 = scalar_lea.vmem [#allocation2], %s1133_s11 }
  0x42   : > { %s1705_s14 = scalar_lea.hbm %s1882_s0, %s1168_s12  ;;  %s196_s22 = sshll.u32 %s189_s15, 4  ;;  %s1711_s22 = int_to_ptr.vmem [resolvable:$true] %s196_s22 }
  0x43   : > { %p1707_p7 = pnand %p1324_p5, %p37_p8  ;;  %s206_s27 = sand.u32 1, %s1552_s18  }
  0x44   : > { %s186_s28 = scalar_lea.sflag [#allocation3], %s1695_s7  ;;  %s1446_s23 = scalar_lea.hbm %s1705_s14, 1024 }
  0x45   : > { %p1447_p10 = scmp.ne.s32.totalorder %s1705_s14, %s1446_s23  ;;  %p1448_p11 = pneg %p1707_p7 }
  0x46   : > { %s1451_s24 = scalar_lea.hbm %s1882_s0, 2048  ;;  %p1452_p0 = scmp.lt.u32.totalorder %s1705_s14, %s1882_s0 }
  0x47   : > { %p1449_p12 = pnand %p1448_p11, %p1447_p10  ;;  %p1453_p2 = scmp.lt.u32.totalorder %s1451_s24, %s1446_s23 }
  0x48   : > { %p1455_p6 = scmp.lt.u32.totalorder %s1446_s23, %s1705_s14 }
  0x49   : > { %p1450_p13 = pneg %p1449_p12  ;;  %p1454_p3 = por %p1453_p2, %p1452_p0 }
  0x4b   : > { %p1456_p9 = por %p1455_p6, %p1454_p3 }
  0x4d   : > { %p1457_p1 = pnand %p1456_p9, %p1450_p13 }
  0x4f   : > { %1460 = shalt.err (!%p1457_p1)
}
  0x50   : > { %s1461_s12 = scalar_lea.vmem %s1711_s22, 1024  ;;  %s1558_s26 = smov [#allocation2]  }
  0x51   : > { %p1462_p4 = scmp.ne.s32.totalorder %s1711_s22, %s1461_s12  ;;  %s1466_s13 = sshll.u32 %s1558_s26, 4  ;;  %s1467_s13 = int_to_ptr.vmem [resolvable:$false] %s1466_s13 }
  0x52   : > { %s1468_s15 = scalar_lea.vmem %s1467_s13, 2048  ;;  %p1469_p10 = scmp.lt.s32.totalorder %s1711_s22, %s1467_s13 }
  0x53   : > { %p1464_p5 = pnand %p1462_p4, %p1448_p11  ;;  %p1470_p12 = scmp.lt.s32.totalorder %s1468_s15, %s1461_s12 }
  0x55   : > { %p1465_p8 = pneg %p1464_p5  ;;  %p1471_p0 = por %p1470_p12, %p1469_p10 }
  0x57   : > { %p1472_p2 = pnand %p1471_p0, %p1465_p8 }
  0x59   : > { %1475 = shalt.err (!%p1472_p2)
}
  0x5a   : > { %1318 = dma.hbm_to_vmem [thread:$0]  (!%p1707_p7), %s1705_s14, 1024, %s1711_s22, %s186_s28, %s1556_s9, %s1556_s9, %s1557_s10  }
  0x5b   : > { %s1136_s23 = sshll.u32 %s1695_s7, 4  ;;  %s1169_s29 = sshll.u32 %s1552_s18, 8 }
  0x5c   : > { %s1750_s6 = scalar_lea.hbm %s1883_s1, %s1169_s29  ;;  %s210_s11 = scalar_lea.vmem [#allocation4], %s1136_s23 }
  0x5d   : > { %s217_s12 = sshll.u32 %s210_s11, 4  ;;  %s1756_s26 = scalar_lea.sflag [#allocation5], %s206_s27  ;;  %s1752_s12 = int_to_ptr.vmem [resolvable:$true] %s217_s12 }
  0x5e   : > { %s1476_s13 = scalar_lea.hbm %s1750_s6, 256  ;;  %s1481_s22 = scalar_lea.hbm %s1883_s1, 512 }
  0x5f   : > { %p1477_p13 = scmp.ne.s32.totalorder %s1750_s6, %s1476_s13  ;;  %p1482_p9 = scmp.lt.u32.totalorder %s1750_s6, %s1883_s1 }
  0x60   : > { %p1483_p1 = scmp.lt.u32.totalorder %s1481_s22, %s1476_s13  ;;  %p1485_p5 = scmp.lt.u32.totalorder %s1476_s13, %s1750_s6 }
  0x61   : > { %p1479_p3 = pnand %p1477_p13, %p1448_p11 }
  0x62   : > { %p1484_p4 = por %p1483_p1, %p1482_p9 }
  0x63   : > { %p1480_p6 = pneg %p1479_p3 }
  0x64   : > { %p1486_p8 = por %p1485_p5, %p1484_p4 }
  0x66   : > { %p1487_p10 = pnand %p1486_p8, %p1480_p6 }
  0x68   : > { %1490 = shalt.err (!%p1487_p10)
}
  0x69   : > { %s1491_s18 = scalar_lea.vmem %s1752_s12, 256  ;;  %s1559_s27 = smov [#allocation4]  }
  0x6a   : > { %p1492_p12 = scmp.ne.s32.totalorder %s1752_s12, %s1491_s18  ;;  %s1496_s23 = sshll.u32 %s1559_s27, 4  ;;  %s1497_s23 = int_to_ptr.vmem [resolvable:$false] %s1496_s23 }
  0x6b   : > { %s1498_s29 = scalar_lea.vmem %s1497_s23, 512  ;;  %p1499_p13 = scmp.lt.s32.totalorder %s1752_s12, %s1497_s23 }
  0x6c   : > { %p1494_p0 = pnand %p1492_p12, %p1448_p11  ;;  %p1500_p3 = scmp.lt.s32.totalorder %s1498_s29, %s1491_s18 }
  0x6e   : > { %p1495_p2 = pneg %p1494_p0  ;;  %p1501_p9 = por %p1500_p3, %p1499_p13 }
  0x70   : > { %p1502_p1 = pnand %p1501_p9, %p1495_p2 }
  0x72   : > { %1505 = shalt.err (!%p1502_p1)
}
  0x73   : > { %1321 = dma.hbm_to_vmem [thread:$0]  (!%p1707_p7), %s1750_s6, 256, %s1752_s12, %s1756_s26, %s1556_s9, %s1556_s9, %s1557_s10  }
  0x74   : > { %p1894_p11 = scmp.ne.s32.totalorder %s1891_s21, 0 }
  0x75   : > { %s231_s30 = sand.u32 (!%p1894_p11), 1, %s1544_s16   ;;  %p1895_p6 = scmp.ne.s32.totalorder (!%p1894_p11), %s1890_s20, 0 }
  0x76   : > { %229 = sbr.rel (%p1894_p11) target bundleno = 931 (0x3a3), region = 36  ;;  %s1140_s24 = sshll.u32 (!%p1894_p11), %s231_s30, 6 }
  0x77   : > { %s232_s11 = scalar_lea.sflag (!%p1894_p11), [#allocation3], %s231_s30  ;;  %s1788_s13 = scalar_lea.vmem (!%p1894_p11), [#allocation2], %s1140_s24 }
  0x7d   : > { %1523 = dma.done.wait (%p1895_p6), %s232_s11, 1024  }
  0x7e   : > { %1525 = vsyncadd (%p1895_p6), %s232_s11, 4294966272  ;;  %s240_s25 = sand.u32 1, %s1605_s19   ;;  %s1141_s7 = sshll.u32 %s231_s30, 4 }
  0x7f   : > { %s241_s9 = scalar_lea.sflag [#allocation5], %s240_s25  ;;  %s244_s10 = scalar_lea.vmem [#allocation4], %s1141_s7 }
  0x80   : > { %1527 = dma.done.wait (%p1895_p6), %s241_s9, 256  }
  0x81   : > { %1529 = vsyncadd (%p1895_p6), %s241_s9, 4294967040  ;;  %p1896_p7 = scmp.eq.s32.totalorder %s1605_s19, 0 }
  0x83   : > { %1531 = dma.done.wait (%p1896_p7), [#allocation5], 256   ;;  %p1897_p4 = pmov %p1896_p7 }
  0x85   : > { %1533 = vsyncadd (%p1897_p4), [#allocation5], 4294967040  ;;  %p1898_p5 = pmov %p1897_p4 }
  0x86   : > { %p1899_p8 = pmov %p1897_p4 }
  0x87   : > { %1535 = dma.done.wait (%p1898_p5), [#allocation8], 256  }
  0x88   : > { %1537 = vsyncadd (%p1899_p8), [#allocation8], 4294967040  ;;  %v295_v0 = vld [vmem:[#allocation7] sm:$0xff]  ;;  %v296_v1 = vld [vmem:[#allocation7 + $0x8] sm:$0xff]  ;;  %vm343_vm0 = vcmask 130048   ;;  %p280_p10 = scmp.lt.s32.totalorder %s1605_s19, 1 }
  0x89   : > { %v283_v2 = vld [vmem:[%s1788_s13] sm:$0xff]  ;;  %v1808_v3 = vpack.c.bf16 %v296_v1, %v295_v0  ;;  %v285_v4 = vld [vmem:[%s1788_s13 + $0x10] sm:$0xff]  ;;  %v284_v7 = vld [vmem:[%s1788_s13 + $0x8] sm:$0xff]  ;;  %vm1025_vm3 = vcmask 0  }
  0x8a   : > { %v287_v5 = vld [vmem:[%s1788_s13 + $0x20] sm:$0xff]  ;;  %v297_v6 = vmax.f32 %v283_v2, %v285_v4  ;;  %v286_v8 = vld [vmem:[%s1788_s13 + $0x18] sm:$0xff]  ;;  %v288_v9 = vld [vmem:[%s1788_s13 + $0x28] sm:$0xff]  ;;  %s1905_s19 = smov (!%p280_p10, %s1605_s19), 1 }
  0x8b   : > { %1263 = vmatprep.subr.bf16.mxu0 %v1808_v3  ;;  %v289_v10 = vld [vmem:[%s1788_s13 + $0x30] sm:$0xff]  ;;  %v298_v11 = vmax.f32 %v284_v7, %v286_v8  ;;  %v1819_v13 = vld [vmem:[%s244_s10 + $0x8] sm:$0xff]  ;;  %v1825_v17 = vld [vmem:[#allocation6] sm:$0xff]  ;;  %s282_s18 = scalar_lea.vmem %s1886_s4, %s1905_s19 }
  0x8c   : > { %v1817_v12 = vld [vmem:[%s244_s10] sm:$0xff]  ;;  %1265 = vmatpush3.bf16.msra.mxu0 %v1808_v3  ;;  %v299_v14 = vmax.f32 %v297_v6, %v287_v5  ;;  %v290_v15 = vld [vmem:[%s1788_s13 + $0x38] sm:$0xff]  ;;  %1224 = vmatprep.mubr.msk.f32.mxu1 %vm343_vm0, %v1825_v17  ;;  %v294_v61 = vld [vmem:[#allocation6 + $0x8] sm:$0xff] }
  0x8d   : > { %v1282_v16 = vpack.c.bf16 %v1819_v13, %v1817_v12  ;;  %v300_v18 = vmax.f32 %v298_v11, %v288_v9 }
  0x8e   : > { %v301_v19 = vmax.f32 %v299_v14, %v289_v10 }
  0x8f   : > { %1283 = vmatprep.subr.bf16.mxu0 %v1282_v16  ;;  %v302_v20 = vmax.f32 %v300_v18, %v290_v15 }
  0x90   : > { %v303_v21 = vsub.f32 %v283_v2, %v301_v19  ;;  %v305_v22 = vsub.f32 %v285_v4, %v301_v19  ;;  %v307_v23 = vsub.f32 %v287_v5, %v301_v19  ;;  %v309_v24 = vsub.f32 %v289_v10, %v301_v19 }
  0x91   : > { %v304_v25 = vsub.f32 %v284_v7, %v302_v20  ;;  %v306_v26 = vsub.f32 %v286_v8, %v302_v20  ;;  %v308_v30 = vsub.f32 %v288_v9, %v302_v20  ;;  %v310_v32 = vsub.f32 %v290_v15, %v302_v20 }
  0x92   : > { %v311_v27 = vmul.f32 1.442695, %v303_v21  ;;  %v315_v28 = vmul.f32 1.442695, %v305_v22  ;;  %v319_v29 = vmul.f32 1.442695, %v307_v23 }
  0x93   : > { %v323_v31 = vmul.f32 1.442695, %v309_v24  ;;  %v313_v33 = vmul.f32 1.442695, %v304_v25  ;;  %v317_v34 = vmul.f32 1.442695, %v306_v26 }
  0x94   : > { %1364 = vpow2.f32 %v311_v27  ;;  %v321_v35 = vmul.f32 1.442695, %v308_v30  ;;  %v325_v36 = vmul.f32 1.442695, %v310_v32 }
  0x95   : > { %1366 = vpow2.f32 %v315_v28 }
  0x96   : > { %1368 = vpow2.f32 %v319_v29 }
  0x97   : > { %1370 = vpow2.f32 %v323_v31 }
  0x98   : > { %1372 = vpow2.f32 %v313_v33 }
  0x99   : > { %1374 = vpow2.f32 %v317_v34 }
  0x9a   : > { %1376 = vpow2.f32 %v321_v35 }
  0x9b   : > { %1378 = vpow2.f32 %v325_v36 }
  0x9e   : > { %v1365_v37 = vpop.eup %1364 }
  0x9f   : > { %v1367_v38 = vpop.eup %1366 }
  0xa0   : > { %v1369_v39 = vpop.eup %1368  ;;  %v327_v40 = vadd.f32 %v1367_v38, %v1365_v37 }
  0xa1   : > { %v1371_v41 = vpop.eup %1370 }
  0xa2   : > { %v1373_v42 = vpop.eup %1372  ;;  %v329_v43 = vadd.f32 %v1369_v39, %v327_v40 }
  0xa3   : > { %v1375_v44 = vpop.eup %1374 }
  0xa4   : > { %v1377_v45 = vpop.eup %1376  ;;  %v331_v46 = vadd.f32 %v1371_v41, %v329_v43  ;;  %v328_v47 = vadd.f32 %v1375_v44, %v1373_v42 }
  0xa5   : > { %v1379_v48 = vpop.eup %1378 }
  0xa6   : > { %1380 = vrcp.f32 %v331_v46  ;;  %v330_v49 = vadd.f32 %v1377_v45, %v328_v47 }
  0xa8   : > { %v332_v50 = vadd.f32 %v1379_v48, %v330_v49 }
  0xaa   : > { %1382 = vrcp.f32 %v332_v50 }
  0xb0   : > { %v1381_v51 = vpop.eup %1380 }
  0xb1   : > { %v335_v52 = vmul.f32 %v1381_v51, %v1365_v37  ;;  %v337_v54 = vmul.f32 %v1381_v51, %v1367_v38  ;;  %v339_v57 = vmul.f32 %v1381_v51, %v1369_v39  ;;  %v1834_v59 = vmul.f32 %v1381_v51, %v1371_v41 }
  0xb3   : > { %1208 = vmatprep.mubr.msk.f32.mxu0 %vm343_vm0, %v335_v52  ;;  %v554_v18 = vmul.f32 9.0, %v335_v52  ;;  %v637_v21 = vmul.f32 9.0, %v337_v54  ;;  %v720_v28 = vmul.f32 9.0, %v339_v57  ;;  %v803_v39 = vmul.f32 9.0, %v1834_v59 }
  0xb4   : > { %v1383_v53 = vpop.eup %1382 }
  0xb5   : > { %v336_v55 = vmul.f32 %v1383_v53, %v1373_v42  ;;  %v338_v56 = vmul.f32 %v1383_v53, %v1375_v44  ;;  %v340_v58 = vmul.f32 %v1383_v53, %v1377_v45  ;;  %v342_v60 = vmul.f32 %v1383_v53, %v1379_v48 }
  0xb7   : > { %1209 = vmatmul.mubr.msk.f32.vlgmr.msra.gmra.mrb[0].mxu0 %vm343_vm0, %v336_v55  ;;  %v555_v15 = vmul.f32 9.0, %v336_v55  ;;  %v638_v20 = vmul.f32 9.0, %v338_v56  ;;  %v721_v26 = vmul.f32 9.0, %v340_v58  ;;  %v804_v36 = vmul.f32 9.0, %v342_v60 }
  0xb8   : > { %1211 = vmatprep.mubr.msk.f32.mxu0 %vm343_vm0, %v337_v54  ;;  %1285 = vmatpush3.bf16.msra.mxu0 %v1282_v16 }
  0xbb   : > { %1212 = vmatmul.mubr.msk.f32.gmra.mrb[2].mxu0 %vm343_vm0, %v338_v56  ;;  %v974_v56 = vmul.f32 9.0, %v1819_v13 }
  0xbc   : > { %1214 = vmatprep.mubr.msk.f32.mxu0 %vm343_vm0, %v339_v57  ;;  %v973_v57 = vmul.f32 9.0, %v1817_v12 }
  0xbf   : > { %1215 = vmatmul.mubr.msk.f32.gmra.mrb[4].mxu0 %vm343_vm0, %v340_v58 }
  0xc0   : > { %1217 = vmatprep.mubr.msk.f32.mxu0 %vm343_vm0, %v1834_v59 }
  0xc3   : > { %1218 = vmatmul.mubr.msk.f32.gmra.mrb[6].mxu0 %vm343_vm0, %v342_v60 }
  0xc4   : > { %1252 = vmatprep.mubr.msk.f32.mxu0 %vm343_vm0, %v1825_v17 }
  0xc7   : > { %1253 = vmatmul.mubr.msk.f32.vlgmr.msra.gmra.mrb[8].mxu0 %vm343_vm0, %v294_v61 }
 0x18a   : > { %v1210_v62 = vpop.f32.mrb[0].mxu0 }
 0x18b   : > { %v434_v63 = vpop.f32.mrb[1].mxu0 }
 0x18c   : > { %v1266_v0 = vpack.c.bf16 %v1210_v62, %v434_v63 }
 0x18e   : > { %v1213_v1 = vpop.f32.mrb[2].mxu0  ;;  %1267 = vmatprep.subr.bf16.mxu1 %v1266_v0 }
 0x18f   : > { %v444_v2 = vpop.f32.mrb[3].mxu0  ;;  %1269 = vmatpush3.bf16.msra.mxu1 %v1266_v0 }
 0x190   : > { %v1270_v4 = vpack.c.bf16 %v1213_v1, %v444_v2 }
 0x192   : > { %v1216_v5 = vpop.f32.mrb[4].mxu0  ;;  %1225 = vmatmul.mubr.msk.f32.vlgmr.msra.gmra.mrb[0].mxu1 %vm343_vm0, %v294_v61  ;;  %1271 = vmatprep.subr.bf16.mxu1 %v1270_v4 }
 0x193   : > { %v454_v6 = vpop.f32.mrb[5].mxu0  ;;  %1273 = vmatpush3.bf16.msra.mxu1 %v1270_v4  ;;  %1231 = vmatprep.mubr.msk.f32.mxu1 %vm343_vm0, %v1825_v17 }
 0x194   : > { %v1274_v7 = vpack.c.bf16 %v1216_v5, %v454_v6 }
 0x196   : > { %v1219_v8 = vpop.f32.mrb[6].mxu0  ;;  %1232 = vmatmul.mubr.msk.f32.vlgmr.msra.gmra.mrb[2].mxu1 %vm343_vm0, %v294_v61  ;;  %1275 = vmatprep.subr.bf16.mxu1 %v1274_v7 }
 0x197   : > { %v464_v9 = vpop.f32.mrb[7].mxu0  ;;  %1277 = vmatpush3.bf16.msra.mxu1 %v1274_v7  ;;  %1238 = vmatprep.mubr.msk.f32.mxu1 %vm343_vm0, %v1825_v17 }
 0x198   : > { %v1278_v10 = vpack.c.bf16 %v1219_v8, %v464_v9 }
 0x19a   : > { %1239 = vmatmul.mubr.msk.f32.vlgmr.msra.gmra.mrb[4].mxu1 %vm343_vm0, %v294_v61  ;;  %1279 = vmatprep.subr.bf16.mxu1 %v1278_v10  ;;  %v1254_v11 = vpop.f32.mrb[8].mxu0 }
 0x19b   : > { %1281 = vmatpush3.bf16.msra.mxu1 %v1278_v10  ;;  %1245 = vmatprep.mubr.msk.f32.mxu1 %vm343_vm0, %v1825_v17  ;;  %v883_v14 = vpop.f32.mrb[9].mxu0 }
 0x19c   : > { %1287 = vmatprep.subr.bf16.mxu1 %v1808_v3 }
 0x19e   : > { %1246 = vmatmul.mubr.msk.f32.vlgmr.msra.gmra.mrb[6].mxu1 %vm343_vm0, %v294_v61  ;;  %v1560_v61 = vmov 0.0  }
 0x19f   : > { %1289 = vmatpush3.bf16.msra.mxu1 %v1808_v3  ;;  %1259 = vmatprep.mubr.msk.f32.mxu1 %vm343_vm0, %v883_v14 }
 0x1a2   : > { %1260 = vmatmul.mubr.msk.f32.vlgmr.msra.gmra.mrb[8].mxu1 %vm343_vm0, %v1254_v11 }
 0x265   : > { %v1226_v16 = vpop.f32.mrb[0].mxu1 }
 0x266   : > { %v545_v19 = vpop.f32.mrb[1].mxu1  ;;  %v557_v22 = vsub.f32 %v1226_v16, %v555_v15 }
 0x267   : > { %v556_v23 = vsub.f32 %v545_v19, %v554_v18 }
 0x268   : > { %v559_v29 = vmul.f32 %v557_v22, %v557_v22 }
 0x269   : > { %v1233_v17 = vpop.f32.mrb[2].mxu1  ;;  %v558_v30 = vmul.f32 %v556_v23, %v556_v23 }
 0x26a   : > { %v640_v24 = vsub.f32 %v1233_v17, %v638_v20  ;;  %v628_v25 = vpop.f32.mrb[3].mxu1 }
 0x26b   : > { %v639_v27 = vsub.f32 %v628_v25, %v637_v21 }
 0x26c   : > { %v642_v3 = vmul.f32 %v640_v24, %v640_v24 }
 0x26d   : > { %v641_v31 = vmul.f32 %v639_v27, %v639_v27  ;;  %v1240_v32 = vpop.f32.mrb[4].mxu1 }
 0x26e   : > { %v644_v33 = vadd.f32 %v642_v3, %v559_v29  ;;  %v723_v34 = vsub.f32 %v1240_v32, %v721_v26  ;;  %v711_v35 = vpop.f32.mrb[5].mxu1 }
 0x26f   : > { %v643_v37 = vadd.f32 %v641_v31, %v558_v30  ;;  %v722_v38 = vsub.f32 %v711_v35, %v720_v28 }
 0x270   : > { %v725_v40 = vmul.f32 %v723_v34, %v723_v34 }
 0x271   : > { %v724_v41 = vmul.f32 %v722_v38, %v722_v38  ;;  %v1247_v42 = vpop.f32.mrb[6].mxu1 }
 0x272   : > { %v727_v43 = vadd.f32 %v725_v40, %v644_v33  ;;  %v806_v44 = vsub.f32 %v1247_v42, %v804_v36  ;;  %v794_v45 = vpop.f32.mrb[7].mxu1 }
 0x273   : > { %v726_v46 = vadd.f32 %v724_v41, %v643_v37  ;;  %v805_v47 = vsub.f32 %v794_v45, %v803_v39 }
 0x274   : > { %v808_v48 = vmul.f32 %v806_v44, %v806_v44 }
 0x275   : > { %v807_v49 = vmul.f32 %v805_v47, %v805_v47  ;;  %v1261_v50 = vpop.f32.mrb[8].mxu1 }
 0x276   : > { %v810_v51 = vadd.f32 %v808_v48, %v727_v43  ;;  %v964_v52 = vpop.f32.mrb[9].mxu1  ;;  %v976_v58 = vsub.f32 %v1261_v50, %v974_v56 }
 0x277   : > { %v809_v53 = vadd.f32 %v807_v49, %v726_v46  ;;  %v975_v59 = vsub.f32 %v964_v52, %v973_v57 }
 0x278   : > { %v812_v54 = vadd.f32 0.01, %v810_v51  ;;  %vm978_vm1 = vcmp.ne.f32.partialorder %v976_v58, 0.0 }
 0x279   : > { %v811_v55 = vadd.f32 0.01, %v809_v53  ;;  %vm977_vm2 = vcmp.ne.f32.partialorder %v975_v59, 0.0  ;;  %v1165_v62 = vsel %vm978_vm1, 1.0, %v1560_v61 }
 0x27a   : > { %1384 = vrcp.f32 %v812_v54  ;;  %v1164_v0 = vsel %vm977_vm2, 1.0, %v1560_v61  ;;  %v1000_v4 = vmul.f32 %v1165_v62, %v1165_v62 }
 0x27b   : > { %1386 = vrcp.f32 %v811_v55  ;;  %v999_v7 = vmul.f32 %v1164_v0, %v1164_v0 }
 0x284   : > { %v1385_v60 = vpop.eup %1384 }
 0x285   : > { %v1387_v63 = vpop.eup %1386  ;;  %v816_v1 = vmul.f32 %v1385_v60, %v810_v51 }
 0x286   : > { %v815_v2 = vmul.f32 %v1387_v63, %v809_v53 }
 0x287   : > { %v984_v5 = vmul.f32 %v1165_v62, %v816_v1  ;;  %v998_v6 = vmul.f32 %v816_v1, %v816_v1 }
 0x288   : > { %v983_v13 = vmul.f32 %v1164_v0, %v815_v2  ;;  %v997_v8 = vmul.f32 %v815_v2, %v815_v2 }
 0x289   : > { %v986_v12 = vsel %vm343_vm0, %v984_v5, 0.0  ;;  %v1002_v9 = vadd.f32 %v1000_v4, %v998_v6 }
 0x28a   : > { %v985_v10 = vsel %vm343_vm0, %v983_v13, 0.0  ;;  %v1001_v11 = vadd.f32 %v999_v7, %v997_v8 }
 0x28b   : > { %v987_v14 = vadd.f32 %v986_v12, %v985_v10  ;;  %v1004_v15 = vsel %vm343_vm0, %v1002_v9, 0.0 }
 0x28c   : > { %v1003_v16 = vsel %vm343_vm0, %v1001_v11, 0.0 }
 0x28d   : > { %988 = vadd.xlane.f32.xlu0 %v987_v14  ;;  %v1005_v18 = vadd.f32 %v1004_v15, %v1003_v16 }
 0x291   : > { %1006 = vadd.xlane.f32.xlu0 %v1005_v18 }
 0x31a   : > { %v989_v19 = vpop.xlane.xlu0 %988 }
 0x31b   : > { %v990_v20 = vrot.slane %v989_v19, 4 }
 0x31d   : > { %v991_v21 = vadd.f32 %v990_v20, %v989_v19 }
 0x31e   : > { %v1007_v22 = vpop.xlane.xlu0 %1006 }
 0x31f   : > { %v992_v23 = vrot.slane %v991_v21, 2  ;;  %v1008_v17 = vrot.slane %v1007_v22, 4 }
 0x321   : > { %v1009_v24 = vadd.f32 %v1008_v17, %v1007_v22  ;;  %v993_v25 = vadd.f32 %v992_v23, %v991_v21 }
 0x323   : > { %v1010_v26 = vrot.slane %v1009_v24, 2  ;;  %v994_v27 = vrot.slane %v993_v25, 1 }
 0x325   : > { %v1011_v28 = vadd.f32 %v1010_v26, %v1009_v24  ;;  %v995_v29 = vadd.f32 %v994_v27, %v993_v25 }
 0x327   : > { %1290 = vpush %v995_v29  ;;  %v1012_v3 = vrot.slane %v1011_v28, 1 }
 0x329   : > { %v1013_v30 = vadd.f32 %v1012_v3, %v1011_v28 }
 0x32b   : > { %1292 = vpush %v1013_v30 }
 0x358   : > { %s1291_s20 = spop %1290 }
 0x359   : > { %s1015_s12 = smul.f32 2.0, %s1291_s20 }
 0x35b   : > { %s1016_s26 = sadd.f32 1.0, %s1015_s12 }
 0x35c   : > { %s1293_s21 = spop %1292 }
 0x35d   : > { %s1017_s6 = sadd.f32 1.0, %s1293_s21 }
 0x35f   : > { %v1018_v31 = vstv %s1017_s6 }
 0x360   : > { %1388 = vrcp.f32 %v1018_v31 }
 0x36a   : > { %v1389_v32 = vpop.eup %1388 }
 0x36b   : > { %1294 = vpush %v1389_v32 }
 0x39c   : > { %s1295_s14 = spop %1294 }
 0x39d   : > { %s1021_s22 = smul.f32 %s1295_s14, %s1016_s26 }
 0x39f   : > { %s1022_s27 = ssub.f32 1.0, %s1021_s22 }
 0x3a1   : > { %v1023_v33 = vstv %s1022_s27 }
 0x3a2   : > { %1026 = vst.msk [vmem:[%s282_s18] sm:$0x1] %vm1025_vm3, %v1023_v33 }
 0x3a3 PF: > { %p18_p12 = scmp.ge.s32.totalorder %s1685_s5, 4   ;;  %s1900_s15 = smov %s1544_s16 }
 0x3a4   : > { %s1901_s16 = smov %s1548_s17  ;;  %s1902_s17 = smov %s1698_s8 }
 0x3a5   : > { %s1903_s18 = smov %s1685_s5  ;;  %20 = sbr.rel (!%p18_p12) target bundleno = 6 (0x6), region = 97 }
 0x3ac   :  { %1044 = vsyncpa [#allocation3], 1 }
 0x3ad   :  { %1046 = vsyncpa [#allocation3 + $0x1], 1 }
 0x3ae   :  { %1047 = vsyncpa [#allocation5], 1 }
 0x3af   :  { %1049 = vsyncpa [#allocation5 + $0x1], 1 }
 0x3b0   :  { %1050 = vsyncpa [#allocation8], 1 }

</bundles_post_ra>
